<compile_context>
chip_gen: v7x
topology: tpu7x:2x2x1
jax: 0.10.0
libtpu: 0.0.40
codegen_flags: <defaults>
</compile_context>

<pallas_src>
import functools

import jax
import jax.numpy as jnp
from jax.experimental import pallas as pl
from jax.experimental.pallas import tpu as pltpu


# ---------------------------------------------------------------------------
# small helpers
# ---------------------------------------------------------------------------
def _round_up(x, m):
    return (x + m - 1) // m * m


def _pick_batch_tile(batch):
    for tb in (4, 2, 1):
        if batch % tb == 0:
            return tb
    return 1


def _layernorm(v, w, b, eps=1e-6):
    # two-pass LN (variance around the mean) for parity with torch.nn.LayerNorm
    mu = jnp.mean(v, axis=-1, keepdims=True)
    d = v - mu
    var = jnp.mean(d * d, axis=-1, keepdims=True)
    return d * jax.lax.rsqrt(var + eps) * w + b


def _erf(z):
    # Abramowitz & Stegun 7.1.26, |err| <= 1.5e-7: only mul/add/exp/select -> safe to lower.
    a1, a2, a3, a4, a5 = 0.254829592, -0.284496736, 1.421413741, -1.453152027, 1.061405429
    p = 0.3275911
    za = jnp.abs(z)
    t = 1.0 / (1.0 + p * za)
    poly = ((((a5 * t + a4) * t + a3) * t + a2) * t + a1) * t
    y = 1.0 - poly * jnp.exp(-(za * za))
    return jnp.where(z >= 0, y, -y)


def _gelu_exact(x):
    # nn.GELU() (erf-based), to float-working precision
    return 0.5 * x * (1.0 + _erf(x * 0.7071067811865476))


# ---------------------------------------------------------------------------
# Kernel 1: patch-embedding matmul + bias (conv_proj with kernel=stride=patch),
#           row-tiled; rows are padded up to the tile so any N works.
# ---------------------------------------------------------------------------
def _patch_embed_kernel(x_ref, w_ref, b_ref, o_ref):
    acc = jnp.dot(x_ref[...], w_ref[...], preferred_element_type=jnp.float32)
    o_ref[...] = (acc + b_ref[...]).astype(o_ref.dtype)


def patch_embed_matmul(patches, w, b):
    """patches: (N, K) bf16, w: (K, D) bf16, b: (1, D) f32 -> (N, D) f32."""
    N, K = patches.shape
    D = w.shape[1]
    if N >= 512:
        tm = 512
    elif N >= 256:
        tm = 256
    else:
        tm = _round_up(N, 16)
    n_pad = _round_up(N, tm)
    if n_pad != N:
        patches = jnp.pad(patches, ((0, n_pad - N), (0, 0)))
    out = pl.pallas_call(
        _patch_embed_kernel,
        out_shape=jax.ShapeDtypeStruct((n_pad, D), jnp.float32),
        grid=(n_pad // tm,),
        in_specs=[
            pl.BlockSpec((tm, K), lambda i: (i, 0)),
            pl.BlockSpec((K, D), lambda i: (0, 0)),
            pl.BlockSpec((1, D), lambda i: (0, 0)),
        ],
        out_specs=pl.BlockSpec((tm, D), lambda i: (i, 0)),
        compiler_params=pltpu.CompilerParams(
            dimension_semantics=("parallel",),
            vmem_limit_bytes=48 * 1024 * 1024,
        ),
    )(patches, w, b)
    return out[:N]


# ---------------------------------------------------------------------------
# Kernel 2: the whole transformer encoder, fused across layers.
#   grid = (B // Tb, L):  batch tiles "parallel" (megacore), layers "arbitrary".
#   The f32 residual stream is the output block, resident in VMEM across the layer axis.
#   Per-layer weights are stacked (L, ...) and indexed by the layer grid index, so the
#   next layer's weight DMA overlaps the current layer's compute (default double buffer).
# ---------------------------------------------------------------------------
def _fused_encoder_kernel(
    x_ref, pos_ref,
    ln1w, ln1b, wq, bq, wk, bk, wv, bv, wo, bo,
    ln2w, ln2b, w1, b1, w2, b2,
    lnfw, lnfb,
    o_ref,
    *, num_heads, head_dim, seq_valid,
):
    layer = pl.program_id(1)
    n_layers = pl.num_programs(1)
    Tb, S, D = o_ref.shape
    H, hd = num_heads, head_dim
    N = Tb * S

    # Layer 0: initialise the resident residual stream = tokens + pos_embed (fused add).
    @pl.when(layer == 0)
    def _():
        o_ref[...] = x_ref[...] + pos_ref[...]

    x = o_ref[...].reshape(N, D)  # f32 residual stream, VMEM-resident across all layers

    # ---- MHSA branch: x = x + attn(LN1(x)) ----
    xn = _layernorm(x, ln1w[0], ln1b[0]).astype(jnp.bfloat16)
    q = (jnp.dot(xn, wq[0], preferred_element_type=jnp.float32) + bq[0]) * (hd ** -0.5)
    k = jnp.dot(xn, wk[0], preferred_element_type=jnp.float32) + bk[0]
    v = jnp.dot(xn, wv[0], preferred_element_type=jnp.float32) + bv[0]

    def split_heads(t):  # (S, D) f32 -> (H, S, hd) bf16, planned head-leading relayout
        return pltpu.einshape("shd->hsd", t.reshape(S, H, hd)).astype(jnp.bfloat16)

    ctx_rows = []
    for bi in range(Tb):  # static, small (Tb <= 4); heads stay batched on the MXU
        rows = slice(bi * S, (bi + 1) * S)
        qb, kb, vb = split_heads(q[rows]), split_heads(k[rows]), split_heads(v[rows])
        s = jnp.einsum("hqd,hkd->hqk", qb, kb, preferred_element_type=jnp.float32)
        if seq_valid < S:  # mask zero-padded key rows (static python check)
            kidx = jax.lax.broadcasted_iota(jnp.int32, (1, 1, S), 2)
            s = jnp.where(kidx < seq_valid, s, -1e30)
        s = s - jnp.max(s, axis=-1, keepdims=True)
        p = jnp.exp(s)
        p = p * pl.reciprocal(jnp.sum(p, axis=-1, keepdims=True), approx=True)
        ctx = jnp.einsum("hqk,hkd->hqd", p.astype(jnp.bfloat16), vb,
                         preferred_element_type=jnp.float32)
        ctx_rows.append(pltpu.einshape("hsd->shd", ctx).reshape(S, D))
    ctx_all = jnp.concatenate(ctx_rows, axis=0) if Tb > 1 else ctx_rows[0]

    attn = jnp.dot(ctx_all.astype(jnp.bfloat16), wo[0],
                   preferred_element_type=jnp.float32) + bo[0]
    x = x + attn

    # ---- MLP branch: x = x + MLP(LN2(x)) with exact (erf) GELU ----
    xn2 = _layernorm(x, ln2w[0], ln2b[0]).astype(jnp.bfloat16)
    h = jnp.dot(xn2, w1[0], preferred_element_type=jnp.float32) + b1[0]
    h = _gelu_exact(h).astype(jnp.bfloat16)
    mlp = jnp.dot(h, w2[0], preferred_element_type=jnp.float32) + b2[0]
    x = (x + mlp).reshape(Tb, S, D)

    @pl.when(layer < n_layers - 1)
    def _():
        o_ref[...] = x

    @pl.when(layer == n_layers - 1)  # fused encoder.ln epilogue on the last layer
    def _():
        o_ref[...] = _layernorm(x.reshape(N, D), lnfw[...], lnfb[...]).reshape(Tb, S, D)


def fused_encoder(x, pos, params, *, num_heads, head_dim, seq_valid):
    """x: (B, S_pad, D) f32 tokens (cls + patches, pos NOT yet added); returns (B, S_pad, D) f32."""
    B, S, D = x.shape
    L = params["wq"].shape[0]
    Tb = _pick_batch_tile(B)

    layer_ws = [
        params["ln1_w"], params["ln1_b"],
        params["wq"], params["bq"], params["wk"], params["bk"],
        params["wv"], params["bv"], params["wo"], params["bo"],
        params["ln2_w"], params["ln2_b"],
        params["w1"], params["b1"], params["w2"], params["b2"],
    ]

    def lspec(arr):  # stacked per-layer weight: block indexed by the layer grid axis
        return pl.BlockSpec((1,) + arr.shape[1:], lambda bt, l: (l, 0, 0))

    kernel = functools.partial(
        _fused_encoder_kernel,
        num_heads=num_heads, head_dim=head_dim, seq_valid=seq_valid,
    )
    # NOTE: x / pos / ln_f specs have layer-constant index maps -> fetched once per batch
    # tile (no per-layer dead DMA); layer weights are double-buffered across the layer axis
    # which is exactly the DMA/compute overlap the perf review asked for.
    return pl.pallas_call(
        kernel,
        out_shape=jax.ShapeDtypeStruct((B, S, D), jnp.float32),
        grid=(B // Tb, L),
        in_specs=[
            pl.BlockSpec((Tb, S, D), lambda bt, l: (bt, 0, 0)),   # tokens (used at l==0)
            pl.BlockSpec((1, S, D), lambda bt, l: (0, 0, 0)),     # pos_embed
        ] + [lspec(w) for w in layer_ws] + [
            pl.BlockSpec((1, D), lambda bt, l: (0, 0)),           # final LN weight
            pl.BlockSpec((1, D), lambda bt, l: (0, 0)),           # final LN bias
        ],
        out_specs=pl.BlockSpec((Tb, S, D), lambda bt, l: (bt, 0, 0)),
        compiler_params=pltpu.CompilerParams(
            dimension_semantics=("parallel", "arbitrary"),
            vmem_limit_bytes=48 * 1024 * 1024,
        ),
    )(x, pos, *layer_ws, params["ln_f_w"], params["ln_f_b"])


# ---------------------------------------------------------------------------
# FeatureEncoder (ViTHashing) forward
# ---------------------------------------------------------------------------
def feature_encoder_forward(x, params, *, patch, num_heads, head_dim):
    """x: (B, C, H, W) NCHW f32. Returns (B, 1 + (H//patch)*(W//patch), D) f32."""
    B, C, H, W = x.shape
    gh, gw = H // patch, W // patch
    P = gh * gw
    D = num_heads * head_dim

    # _process_input: conv_proj(kernel=stride=patch) == patchify + matmul (C, ph, pw order)
    patches = (
        x.reshape(B, C, gh, patch, gw, patch)
        .transpose(0, 2, 4, 1, 3, 5)
        .reshape(B * P, C * patch * patch)
        .astype(jnp.bfloat16)
    )
    tok = patch_embed_matmul(patches, params["patch_w"], params["patch_b"])  # (B*P, D) f32
    tok = tok.reshape(B, P, D)

    # prepend class token (plain-JAX glue); the pos-embed add is fused into the encoder kernel
    cls = jnp.broadcast_to(params["cls_token"], (B, 1, D)).astype(jnp.float32)
    tok = jnp.concatenate([cls, tok], axis=1)                                # (B, S, D) f32

    S = P + 1
    S_pad = _round_up(S, 16)  # bf16 sublane packing: pad to a multiple of 16
    pos = params["pos_embed"]
    if S_pad != S:
        tok = jnp.pad(tok, ((0, 0), (0, S_pad - S), (0, 0)))
        pos = jnp.pad(pos, ((0, 0), (0, S_pad - S), (0, 0)))

    out = fused_encoder(tok, pos, params, num_heads=num_heads,
                        head_dim=head_dim, seq_valid=S)
    return out[:, :S, :]  # drop padded rows


# ---------------------------------------------------------------------------
# Deterministic synthetic parameters (structure mirrors vit_b_16, scaled down).
# Per-layer weights are stacked along a leading L axis for the fused-layer kernel.
# Matmul weights in bf16 (MXU path); LN params / biases in f32.
# ---------------------------------------------------------------------------
def init_params(key, *, C, patch, D, mlp_dim, num_layers, seq_len):
    def nrm(k, shape, scale=0.02, dtype=jnp.float32):
        return (scale * jax.random.normal(k, shape)).astype(dtype)

    L = num_layers
    keys = jax.random.split(key, 9)
    return {
        "patch_w": nrm(keys[0], (C * patch * patch, D), dtype=jnp.bfloat16),
        "patch_b": jnp.zeros((1, D), jnp.float32),
        "cls_token": nrm(keys[1], (1, 1, D)),
        "pos_embed": nrm(keys[2], (1, seq_len, D)),
        "ln_f_w": jnp.ones((1, D), jnp.float32),
        "ln_f_b": jnp.zeros((1, D), jnp.float32),
        "ln1_w": jnp.ones((L, 1, D), jnp.float32),
        "ln1_b": jnp.zeros((L, 1, D), jnp.float32),
        "wq": nrm(keys[3], (L, D, D), dtype=jnp.bfloat16),
        "bq": jnp.zeros((L, 1, D), jnp.float32),
        "wk": nrm(keys[4], (L, D, D), dtype=jnp.bfloat16),
        "bk": jnp.zeros((L, 1, D), jnp.float32),
        "wv": nrm(keys[5], (L, D, D), dtype=jnp.bfloat16),
        "bv": jnp.zeros((L, 1, D), jnp.float32),
        "wo": nrm(keys[6], (L, D, D), dtype=jnp.bfloat16),
        "bo": jnp.zeros((L, 1, D), jnp.float32),
        "ln2_w": jnp.ones((L, 1, D), jnp.float32),
        "ln2_b": jnp.zeros((L, 1, D), jnp.float32),
        "w1": nrm(keys[7], (L, D, mlp_dim), dtype=jnp.bfloat16),
        "b1": jnp.zeros((L, 1, mlp_dim), jnp.float32),
        "w2": nrm(keys[8], (L, mlp_dim, D), dtype=jnp.bfloat16),
        "b2": jnp.zeros((L, 1, D), jnp.float32),
    }


if __name__ == "__main__":
    # Small shapes consistent with the ViT forward: B=2, C=3, 32x32 image, patch=16
    # -> 4 patches + [cls] = seq 5 (padded to 16 internally), hidden 64, 4 heads,
    #    mlp 128, 2 encoder layers.
    B, C, H, W = 2, 3, 32, 32
    PATCH = 16
    NUM_HEADS, HEAD_DIM = 4, 16
    D = NUM_HEADS * HEAD_DIM
    MLP_DIM = 128
    NUM_LAYERS = 2
    SEQ = 1 + (H // PATCH) * (W // PATCH)

    root = jax.random.PRNGKey(0)
    kx, kp = jax.random.split(root)
    x = jax.random.normal(kx, (B, C, H, W), dtype=jnp.float32)
    params = init_params(
        kp, C=C, patch=PATCH, D=D, mlp_dim=MLP_DIM,
        num_layers=NUM_LAYERS, seq_len=SEQ,
    )

    out = feature_encoder_forward(
        x, params, patch=PATCH, num_heads=NUM_HEADS, head_dim=HEAD_DIM
    )
    out = jax.block_until_ready(out)
    assert out.shape == (B, SEQ, D), out.shape
    assert bool(jnp.all(jnp.isfinite(out))), "non-finite output"
    print("KERNEL_OK")
</pallas_src>

<mosaic_0001>
module attributes {stable_mosaic.version = 11 : i64} {
  func.func @_patch_embed_kernel(%arg0: i32, %arg1: memref<16x768xbf16, #tpu.memory_space<vmem>>, %arg2: memref<768x64xbf16, #tpu.memory_space<vmem>>, %arg3: memref<1x64xf32, #tpu.memory_space<vmem>>, %arg4: memref<16x64xf32, #tpu.memory_space<vmem>>) attributes {dimension_semantics = [#tpu.dimension_semantics<parallel>], iteration_bounds = array<i64: 1>, scalar_prefetch = 0 : i64, scratch_operands = 0 : i64, tpu.core_type = #tpu.core_type<tc>, window_params = [{transform_indices = @transform_0, window_bounds = array<i64: 16, 768>}, {pipeline_mode = #tpu.pipeline_mode<synchronous>, transform_indices = @transform_1, window_bounds = array<i64: 768, 64>}, {pipeline_mode = #tpu.pipeline_mode<synchronous>, transform_indices = @transform_2, window_bounds = array<i64: 1, 64>}, {transform_indices = @transform_3, window_bounds = array<i64: 16, 64>}]} {
    %c0 = arith.constant 0 : index
    %c0_0 = arith.constant 0 : index
    %0 = vector.load %arg1[%c0, %c0_0] : memref<16x768xbf16, #tpu.memory_space<vmem>>, vector<16x768xbf16>
    %c0_1 = arith.constant 0 : index
    %c0_2 = arith.constant 0 : index
    %1 = vector.load %arg2[%c0_1, %c0_2] : memref<768x64xbf16, #tpu.memory_space<vmem>>, vector<768x64xbf16>
    %cst = arith.constant dense<0.000000e+00> : vector<16x64xf32>
    %2 = tpu.matmul %0, %1, %cst {dimension_numbers = #tpu.dot_dimension_numbers<[1], [0], [0], [1], [0, 0, 1, 1], [], []>} : vector<16x768xbf16>, vector<768x64xbf16>, vector<16x64xf32> -> vector<16x64xf32>
    %c0_3 = arith.constant 0 : index
    %c0_4 = arith.constant 0 : index
    %3 = vector.load %arg3[%c0_3, %c0_4] : memref<1x64xf32, #tpu.memory_space<vmem>>, vector<1x64xf32>
    %4 = vector.broadcast %3 : vector<1x64xf32> to vector<16x64xf32>
    %5 = arith.addf %2, %4 : vector<16x64xf32>
    %c0_5 = arith.constant 0 : index
    %c0_6 = arith.constant 0 : index
    %6 = vector.load %arg4[%c0_5, %c0_6] : memref<16x64xf32, #tpu.memory_space<vmem>>, vector<16x64xf32>
    tpu.vector_store %arg4[%c0_5, %c0_6], %5 {strides = array<i32>} : memref<16x64xf32, #tpu.memory_space<vmem>>, vector<16x64xf32>,
    return
  }
  func.func @transform_0(%arg0: i32) -> (i32, i32) {
    %c0_i32 = arith.constant 0 : i32
    %c0_i32_0 = arith.constant 0 : i32
    return %arg0, %c0_i32 : i32, i32
  }
  func.func @transform_1(%arg0: i32) -> (i32, i32) {
    %c0_i32 = arith.constant 0 : i32
    %c0_i32_0 = arith.constant 0 : i32
    %c0_i32_1 = arith.constant 0 : i32
    return %c0_i32, %c0_i32_0 : i32, i32
  }
  func.func @transform_2(%arg0: i32) -> (i32, i32) {
    %c0_i32 = arith.constant 0 : i32
    %c0_i32_0 = arith.constant 0 : i32
    %c0_i32_1 = arith.constant 0 : i32
    return %c0_i32, %c0_i32_0 : i32, i32
  }
  func.func @transform_3(%arg0: i32) -> (i32, i32) {
    %c0_i32 = arith.constant 0 : i32
    %c0_i32_0 = arith.constant 0 : i32
    return %arg0, %c0_i32 : i32, i32
  }
}

</mosaic_0001>

<bundles_post_ra>
// kernel: tpu_custom_call.1
= control target key start
LH: loop header
LB: loop body
LE: loop exit
PB: predicated region body
PF: predicated region fallthrough
CT: control target
= control target key end

     0   :  { %s990_s0 = inlined_call_operand.vmem [shape: bf16[16,768], index: 0, kind: input, shape index: {}]   ;;  %s991_s1 = inlined_call_operand.vmem [shape: bf16[768,64], index: 1, kind: input, shape index: {}]   ;;  %s992_s2 = inlined_call_operand.vmem [shape: f32[1,64], index: 2, kind: input, shape index: {}]   ;;  %s993_s3 = inlined_call_operand.hbm [shape: f32[16,64], index: 3, kind: output, shape index: {}]  }
   0x1   :  { %v709_v0 = vld [vmem:[%s991_s1 + $0x40] sm:$0xff]   ;;  %v713_v4 = vld [vmem:[%s991_s1 + $0x48] sm:$0xff]   ;;  %v717_v8 = vld [vmem:[%s991_s1 + $0x50] sm:$0xff]  }
   0x2   :  { %v710_v1 = vld [vmem:[%s991_s1] sm:$0xff]   ;;  %640 = vmatprep.subr.bf16.mxu0 %v709_v0  ;;  %v714_v5 = vld [vmem:[%s991_s1 + $0x8] sm:$0xff]   ;;  %v718_v9 = vld [vmem:[%s991_s1 + $0x10] sm:$0xff]  }
   0x3   :  { %v711_v2 = vld [vmem:[%s991_s1 + $0xc0] sm:$0xff]   ;;  %641 = vmatpush3.bf16.msra.mxu0 %v710_v1  ;;  %v715_v6 = vld [vmem:[%s991_s1 + $0xc8] sm:$0xff]   ;;  %v719_v10 = vld [vmem:[%s991_s1 + $0xd0] sm:$0xff]  }
   0x4   :  { %v712_v3 = vld [vmem:[%s991_s1 + $0x80] sm:$0xff]   ;;  %662 = vmatprep.subr.bf16.mxu1 %v711_v2  ;;  %642 = vmatprep.subr.bf16.mxu0 %v713_v4  ;;  %v716_v7 = vld [vmem:[%s991_s1 + $0x88] sm:$0xff]   ;;  %v720_v11 = vld [vmem:[%s991_s1 + $0x90] sm:$0xff]  }
   0x5   :  { %663 = vmatpush3.bf16.msra.mxu1 %v712_v3  ;;  %v721_v12 = vld [vmem:[%s991_s1 + $0x58] sm:$0xff]   ;;  %v725_v16 = vld [vmem:[%s991_s1 + $0x60] sm:$0xff]   ;;  %v729_v20 = vld [vmem:[%s991_s1 + $0x68] sm:$0xff]  }
   0x6   :  { %664 = vmatprep.subr.bf16.mxu1 %v715_v6  ;;  %v722_v13 = vld [vmem:[%s991_s1 + $0x18] sm:$0xff]   ;;  %v726_v17 = vld [vmem:[%s991_s1 + $0x20] sm:$0xff]   ;;  %v730_v21 = vld [vmem:[%s991_s1 + $0x28] sm:$0xff]  }
   0x7   :  { %643 = vmatpush3.bf16.msra.mxu0 %v714_v5  ;;  %v723_v14 = vld [vmem:[%s991_s1 + $0xd8] sm:$0xff]   ;;  %v727_v18 = vld [vmem:[%s991_s1 + $0xe0] sm:$0xff]   ;;  %v731_v22 = vld [vmem:[%s991_s1 + $0xe8] sm:$0xff]  }
   0x8   :  { %644 = vmatprep.subr.bf16.mxu0 %v717_v8  ;;  %v724_v15 = vld [vmem:[%s991_s1 + $0x98] sm:$0xff]   ;;  %v728_v19 = vld [vmem:[%s991_s1 + $0xa0] sm:$0xff]   ;;  %v732_v23 = vld [vmem:[%s991_s1 + $0xa8] sm:$0xff]  }
   0x9   :  { %665 = vmatpush3.bf16.msra.mxu1 %v716_v7  ;;  %v733_v24 = vld [vmem:[%s991_s1 + $0x70] sm:$0xff]   ;;  %v737_v28 = vld [vmem:[%s991_s1 + $0x78] sm:$0xff]   ;;  %v744_v34 = vld [vmem:[%s991_s1 + $0x140] sm:$0xff]  }
   0xa   :  { %666 = vmatprep.subr.bf16.mxu1 %v719_v10  ;;  %v734_v25 = vld [vmem:[%s991_s1 + $0x30] sm:$0xff]   ;;  %v738_v29 = vld [vmem:[%s991_s1 + $0x38] sm:$0xff]   ;;  %v745_v35 = vld [vmem:[%s990_s0 + $0x8] ss:$24 sps:$4 sm:$0xff]  }
   0xb   :  { %645 = vmatpush3.bf16.msra.mxu0 %v718_v9  ;;  %v735_v26 = vld [vmem:[%s991_s1 + $0xf0] sm:$0xff]   ;;  %v739_v30 = vld [vmem:[%s991_s1 + $0xf8] sm:$0xff]   ;;  %v747_v36 = vld [vmem:[%s990_s0 + $0xc] ss:$24 sps:$4 sm:$0xff]  }
   0xc   :  { %646 = vmatprep.subr.bf16.mxu0 %v721_v12  ;;  %v736_v27 = vld [vmem:[%s991_s1 + $0xb0] sm:$0xff]   ;;  %v740_v31 = vld [vmem:[%s990_s0] ss:$24 sps:$4 sm:$0xff]   ;;  %v742_v32 = vld [vmem:[%s990_s0 + $0x4] ss:$24 sps:$4 sm:$0xff]   ;;  %516 = vmatprep.mubr.bf16.mxu1 %v747_v36 }
   0xd   :  { %667 = vmatpush3.bf16.msra.mxu1 %v720_v11  ;;  %v743_v33 = vld [vmem:[%s991_s1 + $0xb8] sm:$0xff]   ;;  %475 = vmatprep.mubr.bf16.mxu0 %v742_v32  ;;  %v748_v37 = vld [vmem:[%s991_s1 + $0x100] sm:$0xff]   ;;  %v749_v38 = vld [vmem:[%s991_s1 + $0x148] sm:$0xff]  }
   0xe   :  { %668 = vmatprep.subr.bf16.mxu1 %v723_v14  ;;  %v750_v39 = vld [vmem:[%s991_s1 + $0x108] sm:$0xff]   ;;  %v751_v40 = vld [vmem:[%s991_s1 + $0x150] sm:$0xff]   ;;  %v753_v42 = vld [vmem:[%s991_s1 + $0x158] sm:$0xff]  }
   0xf   :  { %647 = vmatpush3.bf16.msra.mxu0 %v722_v13  ;;  %v752_v41 = vld [vmem:[%s991_s1 + $0x110] sm:$0xff]   ;;  %v754_v43 = vld [vmem:[%s991_s1 + $0x118] sm:$0xff]   ;;  %v755_v44 = vld [vmem:[%s991_s1 + $0x160] sm:$0xff]  }
  0x10   :  { %648 = vmatprep.subr.bf16.mxu0 %v725_v16  ;;  %v756_v45 = vld [vmem:[%s991_s1 + $0x120] sm:$0xff]   ;;  %v757_v46 = vld [vmem:[%s991_s1 + $0x168] sm:$0xff]  }
  0x11   :  { %669 = vmatpush3.bf16.msra.mxu1 %v724_v15  ;;  %v765_v47 = vld [vmem:[%s990_s0 + $0x14] ss:$24 sps:$4 sm:$0xff]  }
  0x12   :  { %670 = vmatprep.subr.bf16.mxu1 %v727_v18 }
  0x13   :  { %649 = vmatpush3.bf16.msra.mxu0 %v726_v17 }
  0x14   :  { %650 = vmatprep.subr.bf16.mxu0 %v729_v20 }
  0x15   :  { %671 = vmatpush3.bf16.msra.mxu1 %v728_v19 }
  0x16   :  { %672 = vmatprep.subr.bf16.mxu1 %v731_v22 }
  0x17   :  { %651 = vmatpush3.bf16.msra.mxu0 %v730_v21 }
  0x18   :  { %652 = vmatprep.subr.bf16.mxu0 %v733_v24 }
  0x19   :  { %673 = vmatpush3.bf16.msra.mxu1 %v732_v23 }
  0x1a   :  { %674 = vmatprep.subr.bf16.mxu1 %v735_v26 }
  0x1b   :  { %653 = vmatpush3.bf16.msra.mxu0 %v734_v25 }
  0x1c   :  { %654 = vmatprep.subr.bf16.mxu0 %v737_v28 }
  0x1d   :  { %675 = vmatpush3.bf16.msra.mxu1 %v736_v27 }
  0x1e   :  { %676 = vmatprep.subr.bf16.mxu1 %v739_v30 }
  0x1f   :  { %655 = vmatpush3.bf16.msra.mxu0 %v738_v29 }
  0x20   :  { %684 = vmatprep.subr.bf16.mxu0 %v744_v34 }
  0x21   :  { %677 = vmatpush3.bf16.msra.mxu1 %v743_v33 }
  0x22   :  { %476 = vmatmul.mubr.bf16.vlgmr.msra.gmra.mrb[0].mxu0 %v740_v31 }
  0x23   :  { %685 = vmatpush3.bf16.msra.mxu0 %v748_v37 }
  0x24   :  { %517 = vmatmul.mubr.bf16.vlgmr.msra.gmra.mrb[0].mxu1 %v745_v35  ;;  %686 = vmatprep.subr.bf16.mxu0 %v749_v38 }
  0x27   :  { %687 = vmatpush3.bf16.msra.mxu0 %v750_v39 }
  0x28   :  { %688 = vmatprep.subr.bf16.mxu0 %v751_v40 }
  0x2b   :  { %689 = vmatpush3.bf16.msra.mxu0 %v752_v41 }
  0x2c   :  { %690 = vmatprep.subr.bf16.mxu0 %v753_v42 }
  0x2f   :  { %691 = vmatpush3.bf16.msra.mxu0 %v754_v43 }
  0x30   :  { %692 = vmatprep.subr.bf16.mxu0 %v755_v44 }
  0x31   :  { %8 = vsyncpa [#allocation3], 0  ;;  %557 = vmatprep.mubr.bf16.mxu0 %v765_v47  ;;  %v758_v48 = vld [vmem:[%s991_s1 + $0x128] sm:$0xff]   ;;  %v759_v49 = vld [vmem:[%s991_s1 + $0x170] sm:$0xff]   ;;  %vm566_vm0 = vcmask 523264  }
  0x32   :  { %v760_v50 = vld [vmem:[%s991_s1 + $0x130] sm:$0xff]   ;;  %v761_v51 = vld [vmem:[%s991_s1 + $0x178] sm:$0xff]   ;;  %v585_v55 = vld [vmem:[%s992_s2] ss:$0 sm:$0xff] }
  0x33   :  { %693 = vmatpush3.bf16.msra.mxu0 %v756_v45  ;;  %v762_v52 = vld [vmem:[%s991_s1 + $0x138] sm:$0xff]   ;;  %v763_v53 = vld [vmem:[%s990_s0 + $0x10] ss:$24 sps:$4 sm:$0xff]   ;;  %s790_s0 = smov [#allocation2]  }
  0x34   :  { %694 = vmatprep.subr.bf16.mxu0 %v757_v46  ;;  %s574_s1 = sshll.u32 %s790_s0, 4  ;;  %s575_s1 = int_to_ptr.vmem [resolvable:$true] %s574_s1 }
  0x35   :  { %s766_s2 = scalar_lea.vmem %s575_s1, 256  ;;  %p771_p1 = scmp.lt.s32.totalorder %s575_s1, %s575_s1 }
  0x36   :  { %p767_p0 = scmp.ne.s32.totalorder %s575_s1, %s766_s2  ;;  %p772_p2 = scmp.lt.s32.totalorder %s766_s2, %s766_s2 }
  0x37   :  { %695 = vmatpush3.bf16.msra.mxu0 %v758_v48 }
  0x38   :  { %696 = vmatprep.subr.bf16.mxu0 %v759_v49  ;;  %p773_p3 = por %p772_p2, %p771_p1 }
  0x3a   :  { %p774_p4 = pnand %p773_p3, %p767_p0 }
  0x3b   :  { %697 = vmatpush3.bf16.msra.mxu0 %v760_v50 }
  0x3c   :  { %698 = vmatprep.subr.bf16.mxu0 %v761_v51 }
  0x3f   :  { %699 = vmatpush3.bf16.msra.mxu0 %v762_v52 }
  0x42   :  { %558 = vmatmul.mubr.bf16.vlgmr.msra.gmra.mrb[4].mxu0 %v763_v53 }
  0xf5   :  { %v656_v54 = vpop.f32.mrb[0].mxu0 }
  0xf6   :  { %v657_v56 = vpop.f32.mrb[1].mxu0 }
  0xf7   :  { %v658_v57 = vadd.f32 %v657_v56, %v656_v54  ;;  %v659_v58 = vpop.f32.mrb[2].mxu0  ;;  %v678_v59 = vpop.f32.mrb[0].mxu1 }
  0xf8   :  { %v660_v60 = vpop.f32.mrb[3].mxu0  ;;  %v679_v63 = vpop.f32.mrb[1].mxu1 }
  0xf9   :  { %v478_v61 = vadd.f32 %v658_v57, %v585_v55  ;;  %v661_v62 = vadd.f32 %v660_v60, %v659_v58  ;;  %v680_v0 = vadd.f32 %v679_v63, %v678_v59  ;;  %v681_v1 = vpop.f32.mrb[2].mxu1 }
  0xfa   :  { %v682_v3 = vpop.f32.mrb[3].mxu1 }
  0xfb   :  { %v481_v2 = vadd.f32 %v661_v62, %v585_v55  ;;  %v519_v4 = vadd.f32 %v680_v0, %v478_v61  ;;  %v683_v5 = vadd.f32 %v682_v3, %v681_v1 }
  0xfd   :  { %v522_v6 = vadd.f32 %v683_v5, %v481_v2 }
 0x115   :  { %v700_v7 = vpop.f32.mrb[4].mxu0 }
 0x116   :  { %v701_v8 = vpop.f32.mrb[5].mxu0 }
 0x117   :  { %v702_v9 = vadd.f32 %v701_v8, %v700_v7  ;;  %v703_v10 = vpop.f32.mrb[6].mxu0 }
 0x118   :  { %v704_v11 = vpop.f32.mrb[7].mxu0 }
 0x119   :  { %v560_v12 = vadd.f32 %v702_v9, %v519_v4  ;;  %v705_v13 = vadd.f32 %v704_v11, %v703_v10 }
 0x11b   :  { %567 = vst.msk [vmem:[#allocation2] sm:$0xff] %vm566_vm0, %v560_v12  ;;  %v563_v14 = vadd.f32 %v705_v13, %v522_v6 }
 0x11d   :  { %568 = vst.msk [vmem:[#allocation2 + $0x8] sm:$0xff] %vm566_vm0, %v563_v14 }
 0x11e   :  { %777 = shalt.err (!%p774_p4)
}
 0x11f   :  { %s778_s16 = scalar_lea.hbm %s993_s3, 256 }
 0x120   :  { %p779_p5 = scmp.ne.s32.totalorder %s993_s3, %s778_s16  ;;  %p782_p6 = scmp.lt.u32.totalorder %s778_s16, %s993_s3 }
 0x122   :  { %p784_p7 = pnand %p782_p6, %p779_p5 }
 0x124   :  { %787 = shalt.err (!%p784_p7)
}
 0x125   :  { %s791_s21 = smov 128   ;;  %s792_s22 = smov 8  }
 0x126   :  { %580 = dma.vmem_to_hbm [thread:$0]  %s575_s1, 256, %s993_s3, [#allocation3], %s791_s21, %s791_s21, %s792_s22  }
 0x127   :  { %788 = dma.done.wait [#allocation3], 256  }
 0x128   :  { %789 = vsyncadd [#allocation3], 4294967040 }
 0x129   :  { %584 = vsyncpa [#allocation3], 1 }

</bundles_post_ra>
